<compile_context>
chip_gen: v7x
topology: tpu7x:2x2x1
jax: 0.10.0
libtpu: 0.0.40
codegen_flags: <defaults>
</compile_context>

<pallas_src>
import functools

import jax
import jax.numpy as jnp
from jax import lax
from jax.experimental import pallas as pl
from jax.experimental.pallas import tpu as pltpu


def _mbstd_single_kernel(x_ref, o_ref, *, n, in_lanes, hw):
    """Whole-slab kernel: x_ref (N, C*HW), o_ref (N, (C+1)*HW)."""
    x = x_ref[...]                                   # input dtype, stored as-is
    xf = x.astype(jnp.float32)
    inv_n = 1.0 / n
    inv_nm1 = (1.0 / (n - 1)) if n > 1 else float("nan")   # torch: N==1 -> NaN

    # Two-pass (centered) unbiased variance over the batch axis.
    mu = jnp.sum(xf, axis=0, keepdims=True) * inv_n          # (1, C*HW)
    d = xf - mu
    var = jnp.sum(d * d, axis=0, keepdims=True) * inv_nm1    # (1, C*HW)
    std = jnp.sqrt(var)

    mean_std = jnp.sum(std, keepdims=True) * (1.0 / in_lanes)  # (1, 1)

    # Passthrough copy at the input dtype + fill channel, both static slices.
    o_ref[:, :in_lanes] = x
    fill = jnp.broadcast_to(mean_std, (n, hw)).astype(o_ref.dtype)
    o_ref[:, in_lanes:] = fill


def _mbstd_chunked_kernel(x_ref, o_ref, acc_ref, *, n, in_lanes, n_in_blocks):
    """Chunked kernel.

    x_ref  : (N, CL)  input lane-chunk (index clamped / padded at the edge)
    o_ref  : (N, CL)  output lane-chunk
    acc_ref: (1, 1)   f32 running sum of per-position std over all positions
    """
    g = pl.program_id(0)
    cl = o_ref.shape[1]
    inv_n = 1.0 / n
    inv_nm1 = (1.0 / (n - 1)) if n > 1 else float("nan")

    @pl.when(g == 0)
    def _init():
        acc_ref[...] = jnp.zeros_like(acc_ref)

    x = x_ref[...]

    @pl.when(g < n_in_blocks)
    def _accumulate():
        xf = x.astype(jnp.float32)
        mu = jnp.sum(xf, axis=0, keepdims=True) * inv_n
        d = xf - mu
        var = jnp.sum(d * d, axis=0, keepdims=True) * inv_nm1
        std = jnp.sqrt(var)                                     # (1, CL)
        lane = g * cl + lax.broadcasted_iota(jnp.int32, (1, cl), 1)
        std = jnp.where(lane < in_lanes, std, 0.0)              # mask padded tail
        acc_ref[...] += jnp.sum(std, keepdims=True)             # (1, 1)

    # Any output lane >= in_lanes (the fill channel) only appears in blocks at
    # or after the last input block, by which time the accumulation is final.
    mean_std = acc_ref[...] * (1.0 / in_lanes)                  # (1, 1)
    fill = jnp.broadcast_to(mean_std, x.shape).astype(o_ref.dtype)
    out_lane = g * cl + lax.broadcasted_iota(jnp.int32, x.shape, 1)
    o_ref[...] = jnp.where(out_lane < in_lanes, x, fill)


def mbstd(x, *, chunk_lanes=None, fastpath_max_bytes=32 * 1024 * 1024):
    """x: (N, C, H, W) float -> (N, C+1, H, W), matching the PyTorch MBSTD module."""
    N, C, H, W = x.shape
    HW = H * W
    in_lanes = C * HW
    out_lanes = (C + 1) * HW
    isz = x.dtype.itemsize
    x2 = x.reshape(N, in_lanes)                      # lane-dense 2-D view (free)

    in_bytes = N * in_lanes * isz
    out_bytes = N * out_lanes * isz

    use_fast = chunk_lanes is None and 2 * (in_bytes + out_bytes) <= fastpath_max_bytes
    if in_lanes < 128:
        use_fast = True                              # tiny lane dim: one slab is the sane layout

    cost = pl.CostEstimate(
        flops=4 * N * in_lanes,
        transcendentals=in_lanes,
        bytes_accessed=in_bytes + out_bytes,
    )

    if use_fast:
        vmem_bytes = 2 * (in_bytes + out_bytes) + 3 * N * in_lanes * 4 + (2 << 20)
        vmem_bytes = max(16 << 20, min(vmem_bytes, 64 << 20))
        kernel = functools.partial(_mbstd_single_kernel, n=N, in_lanes=in_lanes, hw=HW)
        out2 = pl.pallas_call(
            kernel,
            out_shape=jax.ShapeDtypeStruct((N, out_lanes), x.dtype),
            grid=(1,),
            in_specs=[pl.BlockSpec((N, in_lanes), lambda i: (0, 0))],
            out_specs=pl.BlockSpec((N, out_lanes), lambda i: (0, 0)),
            compiler_params=pltpu.CompilerParams(
                dimension_semantics=("arbitrary",),
                vmem_limit_bytes=vmem_bytes,
            ),
            cost_estimate=cost,
        )(x2)
        return out2.reshape(N, C + 1, H, W)

    # ---- Chunked fallback for slabs too large to hold in VMEM at once. ----
    if chunk_lanes is None:
        target_block_bytes = 2 * 1024 * 1024
        chunk_lanes = max(128, (target_block_bytes // (N * isz)) // 128 * 128)
    chunk_lanes = min(chunk_lanes, max(128, (out_lanes // 128) * 128))
    chunk_lanes = min(chunk_lanes, max(128, (in_lanes // 128) * 128))
    assert chunk_lanes % 128 == 0, "chunk_lanes must be a multiple of 128"

    n_in_blocks = pl.cdiv(in_lanes, chunk_lanes)
    n_out_blocks = pl.cdiv(out_lanes, chunk_lanes)

    vmem_bytes = 4 * N * chunk_lanes * isz + 3 * N * chunk_lanes * 4 + (2 << 20)
    vmem_bytes = max(16 << 20, min(vmem_bytes, 64 << 20))

    kernel = functools.partial(
        _mbstd_chunked_kernel, n=N, in_lanes=in_lanes, n_in_blocks=n_in_blocks)

    out2 = pl.pallas_call(
        kernel,
        out_shape=jax.ShapeDtypeStruct((N, out_lanes), x.dtype),
        grid=(n_out_blocks,),
        in_specs=[pl.BlockSpec((N, chunk_lanes),
                               lambda g: (0, jnp.minimum(g, n_in_blocks - 1)))],
        out_specs=pl.BlockSpec((N, chunk_lanes), lambda g: (0, g)),
        scratch_shapes=[pltpu.VMEM((1, 1), jnp.float32)],
        compiler_params=pltpu.CompilerParams(
            dimension_semantics=("arbitrary",),   # accumulator carried across steps
            vmem_limit_bytes=vmem_bytes,
        ),
        cost_estimate=cost,
    )(x2)
    return out2.reshape(N, C + 1, H, W)


def mbstd_ref(x):
    # Pure-JAX reference mirroring the PyTorch module.
    std = jnp.std(x, axis=0, ddof=1)
    mean = jnp.mean(std)
    n, _, h, w = x.shape
    fill = jnp.broadcast_to(mean, (n, 1, h, w)).astype(x.dtype)
    return jnp.concatenate([x, fill], axis=1)


if __name__ == "__main__":
    # Required small test (single-step fast path).
    key = jax.random.PRNGKey(0)
    N, C, H, W = 2, 4, 16, 16
    x = jax.random.normal(key, (N, C, H, W), dtype=jnp.float32)

    out = jax.block_until_ready(mbstd(x))
    ref = mbstd_ref(x)
    assert out.shape == (N, C + 1, H, W)
    assert jnp.allclose(out, ref, atol=1e-4, rtol=1e-4), float(
        jnp.max(jnp.abs(out - ref)))

    # Exercise the chunked fallback (forced small chunks), including a block
    # that carries both the last input channels and the fill channel.
    k2 = jax.random.PRNGKey(1)
    x_big = jax.random.normal(k2, (3, 5, 8, 16), dtype=jnp.float32)  # HW=128, C*HW=640
    out_big = jax.block_until_ready(mbstd(x_big, chunk_lanes=256))
    ref_big = mbstd_ref(x_big)
    assert out_big.shape == (3, 6, 8, 16)
    assert jnp.allclose(out_big, ref_big, atol=1e-4, rtol=1e-4), float(
        jnp.max(jnp.abs(out_big - ref_big)))

    print("KERNEL_OK")
</pallas_src>

<mosaic_0001>
module attributes {stable_mosaic.version = 11 : i64} {
  func.func @_mbstd_single_kernel(%arg0: i32, %arg1: memref<2x1024xf32, #tpu.memory_space<vmem>>, %arg2: memref<2x1280xf32, #tpu.memory_space<vmem>>) attributes {dimension_semantics = [#tpu.dimension_semantics<arbitrary>], iteration_bounds = array<i64: 1>, scalar_prefetch = 0 : i64, scratch_operands = 0 : i64, tpu.core_type = #tpu.core_type<tc>, window_params = [{pipeline_mode = #tpu.pipeline_mode<synchronous>, transform_indices = @transform_0, window_bounds = array<i64: 2, 1024>}, {pipeline_mode = #tpu.pipeline_mode<synchronous>, transform_indices = @transform_1, window_bounds = array<i64: 2, 1280>}]} {
    %c0 = arith.constant 0 : index
    %c0_0 = arith.constant 0 : index
    %0 = vector.load %arg1[%c0, %c0_0] : memref<2x1024xf32, #tpu.memory_space<vmem>>, vector<2x1024xf32>
    %cst = arith.constant dense<0.000000e+00> : vector<1024xf32>
    %1 = vector.multi_reduction <add>, %0, %cst [0] : vector<2x1024xf32> to vector<1024xf32>
    %2 = vector.shape_cast %1 : vector<1024xf32> to vector<1x1024xf32>
    %cst_1 = arith.constant 5.000000e-01 : f32
    %3 = vector.broadcast %cst_1 : f32 to vector<1x1024xf32>
    %4 = arith.mulf %2, %3 : vector<1x1024xf32>
    %5 = vector.broadcast %4 : vector<1x1024xf32> to vector<2x1024xf32>
    %6 = arith.subf %0, %5 : vector<2x1024xf32>
    %7 = arith.mulf %6, %6 : vector<2x1024xf32>
    %cst_2 = arith.constant dense<0.000000e+00> : vector<1024xf32>
    %8 = vector.multi_reduction <add>, %7, %cst_2 [0] : vector<2x1024xf32> to vector<1024xf32>
    %9 = vector.shape_cast %8 : vector<1024xf32> to vector<1x1024xf32>
    %cst_3 = arith.constant 1.000000e+00 : f32
    %10 = vector.broadcast %cst_3 : f32 to vector<1x1024xf32>
    %11 = arith.mulf %9, %10 : vector<1x1024xf32>
    %12 = math.sqrt %11 : vector<1x1024xf32>
    %13 = vector.shape_cast %12 : vector<1x1024xf32> to vector<1x1x1024xf32>
    %cst_4 = arith.constant dense<0.000000e+00> : vector<1xf32>
    %14 = vector.multi_reduction <add>, %13, %cst_4 [1, 2] : vector<1x1x1024xf32> to vector<1xf32>
    %15 = vector.shape_cast %14 : vector<1xf32> to vector<1x1x1xf32>
    %16 = vector.extract %15[0, 0, 0] : f32 from vector<1x1x1xf32>
    %17 = vector.broadcast %16 : f32 to vector<1x1xf32>
    %cst_5 = arith.constant 9.765625E-4 : f32
    %18 = vector.broadcast %cst_5 : f32 to vector<1x1xf32>
    %19 = arith.mulf %17, %18 : vector<1x1xf32>
    %c0_6 = arith.constant 0 : index
    %c0_7 = arith.constant 0 : index
    %20 = vector.load %arg2[%c0_6, %c0_7] : memref<2x1280xf32, #tpu.memory_space<vmem>>, vector<2x1024xf32>
    tpu.vector_store %arg2[%c0_6, %c0_7], %0 {strides = array<i32>} : memref<2x1280xf32, #tpu.memory_space<vmem>>, vector<2x1024xf32>,
    %21 = vector.shape_cast %19 : vector<1x1xf32> to vector<1x1xf32>
    %22 = vector.broadcast %21 : vector<1x1xf32> to vector<2x256xf32>
    %c0_8 = arith.constant 0 : index
    %c1024 = arith.constant 1024 : index
    %23 = vector.load %arg2[%c0_8, %c1024] : memref<2x1280xf32, #tpu.memory_space<vmem>>, vector<2x256xf32>
    tpu.vector_store %arg2[%c0_8, %c1024], %22 {strides = array<i32>} : memref<2x1280xf32, #tpu.memory_space<vmem>>, vector<2x256xf32>,
    return
  }
  func.func @transform_0(%arg0: i32) -> (i32, i32) {
    %c0_i32 = arith.constant 0 : i32
    %c0_i32_0 = arith.constant 0 : i32
    %c0_i32_1 = arith.constant 0 : i32
    return %c0_i32, %c0_i32_0 : i32, i32
  }
  func.func @transform_1(%arg0: i32) -> (i32, i32) {
    %c0_i32 = arith.constant 0 : i32
    %c0_i32_0 = arith.constant 0 : i32
    %c0_i32_1 = arith.constant 0 : i32
    return %c0_i32, %c0_i32_0 : i32, i32
  }
}

</mosaic_0001>

<bundles_post_ra>
// kernel: tpu_custom_call.1
= control target key start
LH: loop header
LB: loop body
LE: loop exit
PB: predicated region body
PF: predicated region fallthrough
CT: control target
= control target key end

     0   :  { %6 = vsyncpa [#allocation3], 0  ;;  %s603_s0 = inlined_call_operand.hbm [shape: f32[2,1024], index: 0, kind: input, shape index: {}]   ;;  %s604_s1 = inlined_call_operand.hbm [shape: f32[2,1280], index: 1, kind: output, shape index: {}]  }
   0x1   :  { %7 = vsyncpa [#allocation4], 0  ;;  %s452_s6 = smov [#allocation2]   ;;  %s404_s10 = scalar_lea.hbm %s603_s0, 256 }
   0x2   :  { %s14_s7 = sshll.u32 %s452_s6, 4  ;;  %p405_p0 = scmp.ne.s32.totalorder %s603_s0, %s404_s10  ;;  %s15_s7 = int_to_ptr.vmem [resolvable:$true] %s14_s7 }
   0x3   :  { %p408_p1 = scmp.lt.u32.totalorder %s404_s10, %s603_s0 }
   0x5   :  { %p410_p2 = pnand %p408_p1, %p405_p0 }
   0x7   :  { %413 = shalt.err (!%p410_p2)
}
   0x8   :  { %s414_s15 = scalar_lea.vmem %s15_s7, 256  ;;  %p419_p4 = scmp.lt.s32.totalorder %s15_s7, %s15_s7 }
   0x9   :  { %p415_p3 = scmp.ne.s32.totalorder %s15_s7, %s414_s15  ;;  %p420_p5 = scmp.lt.s32.totalorder %s414_s15, %s414_s15 }
   0xb   :  { %p421_p6 = por %p420_p5, %p419_p4 }
   0xd   :  { %p422_p7 = pnand %p421_p6, %p415_p3 }
   0xf   :  { %425 = shalt.err (!%p422_p7)
}
  0x10   :  { %17 = dma.hbm_to_vmem [thread:$0]  %s603_s0, 256, %s15_s7, [#allocation3]  }
  0x11   :  { %448 = dma.done.wait [#allocation3], 256  }
  0x12   :  { %449 = vsyncadd [#allocation3], 4294967040  ;;  %v29_v0 = vlaneseq  ;;  %v453_v1 = vmov 1983009808   ;;  %v479_v6 = vld [vmem:[#allocation2] sm:$0xff]  ;;  %v481_v7 = vld [vmem:[#allocation2 + $0x8] sm:$0xff] }
  0x13   :  { %v27_v2 = vunpack.c.l.s4 %v453_v1  ;;  %vm67_vm0 = vcmask 1041408   ;;  %v25_v8 = vcombine.high %v479_v6, %v479_v6  ;;  %v42_v10 = vcombine.high %v481_v7, %v481_v7  ;;  %363 = vst [vmem:[#allocation5] sm:$0xff] %v479_v6  ;;  %364 = vst [vmem:[#allocation5 + $0x8] sm:$0xff] %v481_v7  ;;  %s454_s0 = smov [#allocation5]  }
  0x14   :  { %v30_v3 = vshrl.u32 %v29_v0, 7  ;;  %vm336_vm3 = vcmask 1040384   ;;  %s372_s18 = sshll.u32 %s454_s0, 4  ;;  %s373_s18 = int_to_ptr.vmem [resolvable:$true] %s372_s18 }
  0x15   :  { %v28_v4 = vunpack.c.0.s8 %v27_v2  ;;  %s426_s20 = scalar_lea.vmem %s373_s18, 320  ;;  %p431_p9 = scmp.lt.s32.totalorder %s373_s18, %s373_s18 }
  0x16   :  { %p427_p8 = scmp.ne.s32.totalorder %s373_s18, %s426_s20  ;;  %p432_p10 = scmp.lt.s32.totalorder %s426_s20, %s426_s20 }
  0x17   :  { %v477_v5 = vsub.s32 %v28_v4, %v30_v3 }
  0x18   :  { %p433_p11 = por %p432_p10, %p431_p9 }
  0x19   :  { %v32_v9 = vrot.slane %v479_v6, %v477_v5  ;;  %v49_v11 = vrot.slane %v481_v7, %v477_v5  ;;  %v39_v12 = vrot.slane %v25_v8, %v477_v5  ;;  %v56_v14 = vrot.slane %v42_v10, %v477_v5 }
  0x1a   :  { %p434_p12 = pnand %p433_p11, %p427_p8 }
  0x1b   :  { %v40_v13 = vcombine.high %v32_v9, %v32_v9  ;;  %v57_v15 = vcombine.high %v49_v11, %v49_v11  ;;  %v68_v16 = vsel %vm67_vm0, %v32_v9, 0.0  ;;  %v96_v17 = vsel %vm67_vm0, %v49_v11, 0.0 }
  0x1c   :  { %v41_v18 = vcombine.high %v39_v12, %v39_v12  ;;  %v58_v19 = vcombine.high %v56_v14, %v56_v14  ;;  %v69_v20 = vrot.slane %v68_v16, 4  ;;  %v82_v23 = vsel %vm67_vm0, %v39_v12, 0.0 }
  0x1d   :  { %v75_v21 = vsel %vm67_vm0, %v40_v13, 0.0  ;;  %v97_v24 = vrot.slane %v96_v17, 4  ;;  %v103_v25 = vsel %vm67_vm0, %v57_v15, 0.0  ;;  %v83_v27 = vrot.slane %v82_v23, 4 }
  0x1e   :  { %v76_v22 = vrot.slane %v75_v21, 4  ;;  %v70_v26 = vadd.f32 %v69_v20, %v68_v16  ;;  %v89_v28 = vsel %vm67_vm0, %v41_v18, 0.0  ;;  %v104_v29 = vrot.slane %v103_v25, 4 }
  0x1f   :  { %v90_v31 = vrot.slane %v89_v28, 4  ;;  %v98_v32 = vadd.f32 %v97_v24, %v96_v17  ;;  %v110_v33 = vsel %vm67_vm0, %v56_v14, 0.0  ;;  %v84_v35 = vadd.f32 %v83_v27, %v82_v23 }
  0x20   :  { %v77_v30 = vadd.f32 %v76_v22, %v75_v21  ;;  %v71_v34 = vrot.slane %v70_v26, 2  ;;  %v105_v36 = vadd.f32 %v104_v29, %v103_v25  ;;  %v111_v37 = vrot.slane %v110_v33, 4 }
  0x21   :  { %v91_v39 = vadd.f32 %v90_v31, %v89_v28  ;;  %v99_v40 = vrot.slane %v98_v32, 2  ;;  %v117_v41 = vsel %vm67_vm0, %v58_v19, 0.0  ;;  %v85_v43 = vrot.slane %v84_v35, 2 }
  0x22   :  { %v78_v38 = vrot.slane %v77_v30, 2  ;;  %v72_v42 = vadd.f32 %v71_v34, %v70_v26  ;;  %v106_v44 = vrot.slane %v105_v36, 2  ;;  %v112_v45 = vadd.f32 %v111_v37, %v110_v33 }
  0x23   :  { %v92_v47 = vrot.slane %v91_v39, 2  ;;  %v100_v48 = vadd.f32 %v99_v40, %v98_v32  ;;  %v118_v49 = vrot.slane %v117_v41, 4  ;;  %v86_v51 = vadd.f32 %v85_v43, %v84_v35 }
  0x24   :  { %v79_v46 = vadd.f32 %v78_v38, %v77_v30  ;;  %v73_v50 = vrot.slane %v72_v42, 1  ;;  %v107_v52 = vadd.f32 %v106_v44, %v105_v36  ;;  %v113_v53 = vrot.slane %v112_v45, 2 }
  0x25   :  { %v93_v55 = vadd.f32 %v92_v47, %v91_v39  ;;  %v101_v56 = vrot.slane %v100_v48, 1  ;;  %v119_v57 = vadd.f32 %v118_v49, %v117_v41  ;;  %v87_v59 = vrot.slane %v86_v51, 1 }
  0x26   :  { %v80_v54 = vrot.slane %v79_v46, 1  ;;  %v74_v58 = vadd.f32 %v73_v50, %v72_v42  ;;  %v108_v60 = vrot.slane %v107_v52, 1  ;;  %v114_v61 = vadd.f32 %v113_v53, %v112_v45 }
  0x27   :  { %v94_v63 = vrot.slane %v93_v55, 1  ;;  %v102_v0 = vadd.f32 %v101_v56, %v100_v48  ;;  %v120_v1 = vrot.slane %v119_v57, 2  ;;  %v88_v2 = vadd.f32 %v87_v59, %v86_v51 }
  0x28   :  { %v81_v62 = vadd.f32 %v80_v54, %v79_v46  ;;  %v109_v3 = vadd.f32 %v108_v60, %v107_v52  ;;  %v115_v4 = vrot.slane %v114_v61, 1  ;;  %v124_v8 = vmul.f32 0.5, %v74_v58 }
  0x29   :  { %v95_v9 = vadd.f32 %v94_v63, %v93_v55  ;;  %v121_v10 = vadd.f32 %v120_v1, %v119_v57  ;;  %v128_v12 = vmul.f32 0.5, %v102_v0  ;;  %v126_v14 = vmul.f32 0.5, %v88_v2 }
  0x2a   :  { %v125_v11 = vmul.f32 0.5, %v81_v62  ;;  %v116_v13 = vadd.f32 %v115_v4, %v114_v61  ;;  %v129_v15 = vmul.f32 0.5, %v109_v3 }
  0x2b   :  { %v122_v16 = vrot.slane %v121_v10, 1  ;;  %v127_v17 = vmul.f32 0.5, %v95_v9 }
  0x2c   :  { %v140_v18 = vcombine.low %v124_v8, %v125_v11  ;;  %v130_v19 = vmul.f32 0.5, %v116_v13  ;;  %v157_v23 = vcombine.low %v128_v12, %v129_v15 }
  0x2d   :  { %v123_v20 = vadd.f32 %v122_v16, %v121_v10  ;;  %v141_v21 = vcombine.low %v126_v14, %v127_v17 }
  0x2e   :  { %v148_v22 = vrot.slane %v140_v18, %v477_v5  ;;  %v165_v28 = vrot.slane %v157_v23, %v477_v5 }
  0x2f   :  { %v131_v24 = vmul.f32 0.5, %v123_v20  ;;  %v155_v25 = vrot.slane %v141_v21, %v477_v5 }
  0x31   :  { %v156_v26 = vcombine.low %v148_v22, %v155_v25  ;;  %v158_v27 = vcombine.low %v130_v19, %v131_v24 }
  0x33   :  { %v172_v29 = vrot.slane %v158_v27, %v477_v5  ;;  %v176_v30 = vsub.f32 %v479_v6, %v156_v26 }
  0x35   :  { %v173_v31 = vcombine.low %v165_v28, %v172_v29  ;;  %v178_v32 = vmul.f32 %v176_v30, %v176_v30 }
  0x37   :  { %v177_v33 = vsub.f32 %v481_v7, %v173_v31  ;;  %v182_v34 = vcombine.high %v178_v32, %v178_v32  ;;  %v189_v35 = vrot.slane %v178_v32, %v477_v5 }
  0x39   :  { %v179_v36 = vmul.f32 %v177_v33, %v177_v33  ;;  %v196_v37 = vrot.slane %v182_v34, %v477_v5  ;;  %v197_v38 = vcombine.high %v189_v35, %v189_v35  ;;  %v224_v39 = vsel %vm67_vm0, %v189_v35, 0.0 }
  0x3a   :  { %v225_v40 = vrot.slane %v224_v39, 4 }
  0x3b   :  { %v198_v41 = vcombine.high %v196_v37, %v196_v37  ;;  %v199_v42 = vcombine.high %v179_v36, %v179_v36  ;;  %v206_v43 = vrot.slane %v179_v36, %v477_v5  ;;  %v231_v6 = vsel %vm67_vm0, %v197_v38, 0.0 }
  0x3c   :  { %v226_v44 = vadd.f32 %v225_v40, %v224_v39  ;;  %v232_v45 = vrot.slane %v231_v6, 4  ;;  %v238_v7 = vsel %vm67_vm0, %v196_v37, 0.0 }
  0x3d   :  { %v213_v46 = vrot.slane %v199_v42, %v477_v5  ;;  %v214_v47 = vcombine.high %v206_v43, %v206_v43  ;;  %v239_v48 = vrot.slane %v238_v7, 4  ;;  %v245_v49 = vsel %vm67_vm0, %v198_v41, 0.0 }
  0x3e   :  { %v227_v50 = vrot.slane %v226_v44, 2  ;;  %v233_v51 = vadd.f32 %v232_v45, %v231_v6  ;;  %v246_v52 = vrot.slane %v245_v49, 4  ;;  %v252_v53 = vsel %vm67_vm0, %v206_v43, 0.0 }
  0x3f   :  { %v215_v54 = vcombine.high %v213_v46, %v213_v46  ;;  %v240_v55 = vadd.f32 %v239_v48, %v238_v7  ;;  %v253_v56 = vrot.slane %v252_v53, 4  ;;  %v259_v57 = vsel %vm67_vm0, %v214_v47, 0.0 }
  0x40   :  { %v228_v58 = vadd.f32 %v227_v50, %v226_v44  ;;  %v234_v59 = vrot.slane %v233_v51, 2  ;;  %v247_v60 = vadd.f32 %v246_v52, %v245_v49  ;;  %v260_v61 = vrot.slane %v259_v57, 4 }
  0x41   :  { %v241_v62 = vrot.slane %v240_v55, 2  ;;  %v254_v5 = vadd.f32 %v253_v56, %v252_v53  ;;  %v266_v63 = vsel %vm67_vm0, %v213_v46, 0.0  ;;  %v273_v0 = vsel %vm67_vm0, %v215_v54, 0.0 }
  0x42   :  { %v229_v1 = vrot.slane %v228_v58, 1  ;;  %v235_v2 = vadd.f32 %v234_v59, %v233_v51  ;;  %v248_v3 = vrot.slane %v247_v60, 2  ;;  %v261_v4 = vadd.f32 %v260_v61, %v259_v57 }
  0x43   :  { %v242_v8 = vadd.f32 %v241_v62, %v240_v55  ;;  %v255_v9 = vrot.slane %v254_v5, 2  ;;  %v267_v10 = vrot.slane %v266_v63, 4  ;;  %v274_v11 = vrot.slane %v273_v0, 4 }
  0x44   :  { %v230_v12 = vadd.f32 %v229_v1, %v228_v58  ;;  %v236_v13 = vrot.slane %v235_v2, 1  ;;  %v249_v14 = vadd.f32 %v248_v3, %v247_v60  ;;  %v262_v15 = vrot.slane %v261_v4, 2 }
  0x45   :  { %v243_v16 = vrot.slane %v242_v8, 1  ;;  %v256_v17 = vadd.f32 %v255_v9, %v254_v5  ;;  %v268_v18 = vadd.f32 %v267_v10, %v266_v63  ;;  %v275_v19 = vadd.f32 %v274_v11, %v273_v0 }
  0x46   :  { %v237_v20 = vadd.f32 %v236_v13, %v235_v2  ;;  %v250_v21 = vrot.slane %v249_v14, 1  ;;  %v263_v22 = vadd.f32 %v262_v15, %v261_v4  ;;  %388 = vrsqrt.f32 %v230_v12 }
  0x47   :  { %v244_v23 = vadd.f32 %v243_v16, %v242_v8  ;;  %v257_v24 = vrot.slane %v256_v17, 1  ;;  %v269_v25 = vrot.slane %v268_v18, 2  ;;  %v276_v26 = vrot.slane %v275_v19, 2 }
  0x48   :  { %v521_v27 = vadd.f32 %v250_v21, %v249_v14  ;;  %v264_v28 = vrot.slane %v263_v22, 1  ;;  %390 = vrsqrt.f32 %v237_v20  ;;  %vm282_vm1 = vcmp.eq.f32.partialorder %v230_v12, inf }
  0x49   :  { %v270_v29 = vadd.f32 %v269_v25, %v268_v18  ;;  %v277_v30 = vadd.f32 %v276_v26, %v275_v19  ;;  %v523_v31 = vadd.f32 %v257_v24, %v256_v17  ;;  %392 = vrsqrt.f32 %v244_v23 }
  0x4a   :  { %v525_v32 = vadd.f32 %v264_v28, %v263_v22  ;;  %394 = vrsqrt.f32 %v521_v27  ;;  %v285_v38 = vand.u32 2147483648, %v230_v12  ;;  %vm284_vm2 = vcmp.eq.f32.partialorder %v230_v12, 0.0 }
  0x4b   :  { %v271_v33 = vrot.slane %v270_v29, 1  ;;  %v278_v34 = vrot.slane %v277_v30, 1  ;;  %396 = vrsqrt.f32 %v523_v31  ;;  %vm289_vm4 = vcmp.eq.f32.partialorder %v237_v20, inf }
  0x4c   :  { %398 = vrsqrt.f32 %v525_v32  ;;  %vm291_vm5 = vcmp.eq.f32.partialorder %v237_v20, 0.0  ;;  %v292_v40 = vand.u32 2147483648, %v237_v20  ;;  %vm296_vm6 = vcmp.eq.f32.partialorder %v244_v23, inf }
  0x4d   :  { %v528_v35 = vadd.f32 %v271_v33, %v270_v29  ;;  %v530_v36 = vadd.f32 %v278_v34, %v277_v30  ;;  %vm298_vm7 = vcmp.eq.f32.partialorder %v244_v23, 0.0  ;;  %v299_v42 = vand.u32 2147483648, %v244_v23 }
  0x4e   :  { %vm303_vm8 = vcmp.eq.f32.partialorder %v521_v27, inf  ;;  %vm305_vm9 = vcmp.eq.f32.partialorder %v521_v27, 0.0  ;;  %v306_v44 = vand.u32 2147483648, %v521_v27  ;;  %vm310_vm10 = vcmp.eq.f32.partialorder %v523_v31, inf }
  0x4f   :  { %400 = vrsqrt.f32 %v528_v35  ;;  %vm312_vm11 = vcmp.eq.f32.partialorder %v523_v31, 0.0  ;;  %v313_v46 = vand.u32 2147483648, %v523_v31  ;;  %vm317_vm12 = vcmp.eq.f32.partialorder %v525_v32, inf }
  0x50   :  { %v389_v37 = vpop.eup %388  ;;  %402 = vrsqrt.f32 %v530_v36  ;;  %vm319_vm13 = vcmp.eq.f32.partialorder %v525_v32, 0.0  ;;  %v320_v49 = vand.u32 2147483648, %v525_v32  ;;  %vm324_vm14 = vcmp.eq.f32.partialorder %v528_v35, inf }
  0x51   :  { %v281_v39 = vmul.f32 %v389_v37, %v230_v12  ;;  %vm326_vm15 = vcmp.eq.f32.partialorder %v528_v35, 0.0  ;;  %v327_v56 = vand.u32 2147483648, %v528_v35  ;;  %vm331_vm0 = vcmp.eq.f32.partialorder %v530_v36, inf }
  0x52   :  { %v391_v43 = vpop.eup %390  ;;  %v334_v8 = vand.u32 2147483648, %v530_v36 }
  0x53   :  { %v283_v41 = vsel %vm282_vm1, %v230_v12, %v281_v39  ;;  %v393_v45 = vpop.eup %392  ;;  %v288_v7 = vmul.f32 %v391_v43, %v237_v20  ;;  %vm333_vm1 = vcmp.eq.f32.partialorder %v530_v36, 0.0 }
  0x54   :  { %v286_v6 = vsel %vm284_vm2, %v285_v38, %v283_v41  ;;  %v395_v47 = vpop.eup %394  ;;  %v295_v48 = vmul.f32 %v393_v45, %v244_v23 }
  0x55   :  { %v290_v50 = vsel %vm289_vm4, %v237_v20, %v288_v7  ;;  %v302_v51 = vmul.f32 %v395_v47, %v521_v27  ;;  %v337_v52 = vsel %vm336_vm3, %v286_v6, 0.0  ;;  %v397_v53 = vpop.eup %396 }
  0x56   :  { %v293_v54 = vsel %vm291_vm5, %v292_v40, %v290_v50  ;;  %v297_v55 = vsel %vm296_vm6, %v244_v23, %v295_v48  ;;  %v399_v57 = vpop.eup %398  ;;  %v309_v60 = vmul.f32 %v397_v53, %v523_v31 }
  0x57   :  { %v300_v58 = vsel %vm298_vm7, %v299_v42, %v297_v55  ;;  %v304_v59 = vsel %vm303_vm8, %v521_v27, %v302_v51  ;;  %v338_v61 = vsel %vm336_vm3, %v293_v54, 0.0  ;;  %v316_v63 = vmul.f32 %v399_v57, %v525_v32 }
  0x58   :  { %v307_v5 = vsel %vm305_vm9, %v306_v44, %v304_v59  ;;  %v339_v0 = vadd.f32 %v338_v61, %v337_v52  ;;  %v340_v1 = vsel %vm336_vm3, %v300_v58, 0.0  ;;  %v311_v3 = vsel %vm310_vm10, %v523_v31, %v309_v60 }
  0x59   :  { %v401_v62 = vpop.eup %400  ;;  %v342_v9 = vsel %vm336_vm3, %v307_v5, 0.0  ;;  %v314_v10 = vsel %vm312_vm11, %v313_v46, %v311_v3  ;;  %v318_v11 = vsel %vm317_vm12, %v525_v32, %v316_v63 }
  0x5a   :  { %v403_v2 = vpop.eup %402  ;;  %v323_v4 = vmul.f32 %v401_v62, %v528_v35  ;;  %v341_v13 = vadd.f32 %v340_v1, %v339_v0  ;;  %v321_v14 = vsel %vm319_vm13, %v320_v49, %v318_v11  ;;  %v344_v16 = vsel %vm336_vm3, %v314_v10, 0.0 }
  0x5b   :  { %v330_v12 = vmul.f32 %v403_v2, %v530_v36  ;;  %v346_v20 = vsel %vm336_vm3, %v321_v14, 0.0 }
  0x5c   :  { %v325_v15 = vsel %vm324_vm14, %v528_v35, %v323_v4  ;;  %v343_v19 = vadd.f32 %v342_v9, %v341_v13 }
  0x5d   :  { %v328_v17 = vsel %vm326_vm15, %v327_v56, %v325_v15  ;;  %v332_v18 = vsel %vm331_vm0, %v530_v36, %v330_v12 }
  0x5e   :  { %v335_v21 = vsel %vm333_vm1, %v334_v8, %v332_v18  ;;  %v345_v22 = vadd.f32 %v344_v16, %v343_v19  ;;  %v348_v23 = vsel %vm336_vm3, %v328_v17, 0.0 }
  0x5f   :  { %v350_v25 = vsel %vm336_vm3, %v335_v21, 0.0 }
  0x60   :  { %v347_v24 = vadd.f32 %v346_v20, %v345_v22 }
  0x62   :  { %v349_v26 = vadd.f32 %v348_v23, %v347_v24 }
  0x64   :  { %v351_v27 = vadd.f32 %v350_v25, %v349_v26 }
  0x66   :  { %352 = vadd.xlane.f32.xlu0 %v351_v27 }
  0xf3   :  { %v353_v28 = vpop.xlane.xlu0 %352 }
  0xf4   :  { %v354_v29 = vrot.slane %v353_v28, 4 }
  0xf6   :  { %v355_v30 = vadd.f32 %v354_v29, %v353_v28 }
  0xf8   :  { %v356_v31 = vrot.slane %v355_v30, 2 }
  0xfa   :  { %v357_v32 = vadd.f32 %v356_v31, %v355_v30 }
  0xfc   :  { %v358_v33 = vrot.slane %v357_v32, 1 }
  0xfe   :  { %v359_v34 = vadd.f32 %v358_v33, %v357_v32 }
 0x100   :  { %381 = vpush %v359_v34 }
 0x131   :  { %s382_s19 = spop %381 }
 0x132   :  { %v361_v35 = vstv %s382_s19 }
 0x133   :  { %v362_v36 = vmul.f32 0.0009765625, %v361_v35 }
 0x135   :  { %365 = vst [vmem:[#allocation5 + $0x10] sm:$0xf] %v362_v36 }
 0x136   :  { %437 = shalt.err (!%p434_p12)
}
 0x137   :  { %s438_s23 = scalar_lea.hbm %s604_s1, 320 }
 0x138   :  { %p439_p13 = scmp.ne.s32.totalorder %s604_s1, %s438_s23  ;;  %p442_p0 = scmp.lt.u32.totalorder %s438_s23, %s604_s1 }
 0x13a   :  { %p444_p1 = pnand %p442_p0, %p439_p13 }
 0x13c   :  { %447 = shalt.err (!%p444_p1)
}
 0x13d   :  { %375 = dma.vmem_to_hbm [thread:$0]  %s373_s18, 320, %s604_s1, [#allocation4]  }
 0x13e   :  { %450 = dma.done.wait [#allocation4], 320  }
 0x13f   :  { %451 = vsyncadd [#allocation4], 4294966976 }
 0x140   :  { %379 = vsyncpa [#allocation3], 1 }
 0x141   :  { %380 = vsyncpa [#allocation4], 1 }

</bundles_post_ra>
